<compile_context>
chip_gen: v6e
topology: v6e:2x2x1
jax: 0.10.0
libtpu: 0.0.40
codegen_flags: <defaults>
</compile_context>

<pallas_src>
import jax
import jax.numpy as jnp
from jax.experimental import pallas as pl
from jax.experimental.pallas import tpu as pltpu


def _round_up(x, m):
    return (x + m - 1) // m * m


def _choose_row_tile(n_rows, max_tile):
    """16-aligned row tile; prefer an even grid (>= 2 steps) for v7x's 2 TCs."""
    if n_rows <= 16:
        return _round_up(max(n_rows, 1), 16)
    steps = max(2, pl.cdiv(n_rows, max_tile))
    if steps % 2:
        steps += 1                      # even grid -> both TensorCores get work
    return _round_up(pl.cdiv(n_rows, steps), 16)


# ----------------------------------------------------------------------------
# Kernel: L bias-free Linear layers with ReLU between them (none after last).
# x tile arrives as f32 and is cast to bf16 on-chip (no host pre-pass).
# ----------------------------------------------------------------------------
def _make_mlp_kernel(n_layers, relu_bf16):
    def kernel(x_ref, *refs):
        o_ref = refs[n_layers]
        h = x_ref[...].astype(jnp.bfloat16)            # on-chip cast (VPU)
        for i in range(n_layers):
            acc = jnp.dot(h, refs[i][...],             # bf16 x bf16 -> f32 MXU
                          preferred_element_type=jnp.float32)
            if i < n_layers - 1:
                if relu_bf16:                          # bf16 VALU path (v6e/v7x)
                    h = jnp.maximum(acc.astype(jnp.bfloat16), 0)
                else:                                  # f32 VPU path (v5e)
                    h = jnp.maximum(acc, 0.0).astype(jnp.bfloat16)
            else:
                o_ref[...] = acc.astype(o_ref.dtype)
    return kernel


def mlp_pallas(x, weights, *, tile_n=2048, relu_bf16=None):
    """x: (N, Din) float.  weights: list of (Din_i, Dout_i) f32 ("x @ W" layout)."""
    N, din = x.shape
    dout = weights[-1].shape[1]
    n_layers = len(weights)

    if relu_bf16 is None:
        kind = jax.devices()[0].device_kind.lower()
        # bf16 elementwise only pays off on v6e/v7x; older gens use the f32 path.
        relu_bf16 = not any(t in kind for t in ("v2", "v3", "v4", "v5"))

    tile = _choose_row_tile(N, tile_n)
    grid = (pl.cdiv(N, tile),)

    # bf16 matmul operands (MXU fast path); weights are tiny so the cast is cheap.
    ws = [w.astype(jnp.bfloat16) for w in weights]

    x_spec = pl.BlockSpec((tile, din), lambda i: (i, 0))
    w_specs = [pl.BlockSpec(w.shape, lambda i: (0, 0)) for w in ws]  # VMEM-resident
    o_spec = pl.BlockSpec((tile, dout), lambda i: (i, 0))

    flops = 2 * N * sum(int(w.shape[0]) * int(w.shape[1]) for w in ws)
    bytes_accessed = (N * din * 4
                      + sum(w.size * 2 for w in ws)
                      + N * dout * 4)

    # Only raise the scoped-VMEM limit when the model is big enough to need it
    # (keep headroom under v7x's 64 MiB physical VMEM).
    max_width = max(int(w.shape[1]) for w in ws)
    vmem_need = (2 * tile * din * 4 + 2 * tile * dout * 4      # x / out (dbl-buf)
                 + 2 * sum(w.size * 2 for w in ws)             # weights (dbl-buf)
                 + 8 * tile * max_width)                       # live h/acc vregs
    vmem_limit = min(2 * int(vmem_need), 64 << 20) if vmem_need > (12 << 20) else None

    out = pl.pallas_call(
        _make_mlp_kernel(n_layers, relu_bf16),
        out_shape=jax.ShapeDtypeStruct((N, dout), jnp.float32),
        grid_spec=pltpu.PrefetchScalarGridSpec(
            num_scalar_prefetch=0,
            grid=grid,
            in_specs=[x_spec] + w_specs,
            out_specs=o_spec,
        ),
        compiler_params=pltpu.CompilerParams(
            dimension_semantics=("parallel",),
            vmem_limit_bytes=vmem_limit),
        cost_estimate=pl.CostEstimate(flops=int(flops), transcendentals=0,
                                      bytes_accessed=int(bytes_accessed)),
    )(x.astype(jnp.float32), *ws)           # module does x.float()

    return out


# ----------------------------------------------------------------------------
# Parameter construction: kaiming_uniform_(nonlinearity='relu'), no biases
# (matches _MLP._init_weights; bias=False so the bias fill is skipped).
# ----------------------------------------------------------------------------
def init_mlp_weights(key, cfg):
    dims = ([cfg['n_input_dims']]
            + [cfg['n_neurons']] * cfg['n_hidden_layers']
            + [cfg['n_output_dims']])
    weights = []
    for fan_in, fan_out in zip(dims[:-1], dims[1:]):
        key, kw = jax.random.split(key)
        bound = (6.0 / fan_in) ** 0.5          # gain(sqrt(2)) * sqrt(3/fan_in)
        weights.append(jax.random.uniform(kw, (fan_in, fan_out), jnp.float32,
                                          -bound, bound))
    return weights


# ----------------------------------------------------------------------------
# Pure-JAX references (f32, and a bf16-matmul variant matching kernel math).
# ----------------------------------------------------------------------------
def mlp_ref(x, weights, matmul_dtype=jnp.float32):
    h = x.astype(jnp.float32)
    for i, w in enumerate(weights):
        h = jnp.dot(h.astype(matmul_dtype), w.astype(matmul_dtype),
                    preferred_element_type=jnp.float32)
        if i < len(weights) - 1:
            h = jnp.maximum(h, 0.0)
    return h


if __name__ == "__main__":
    # Small deterministic demo shapes consistent with the module's cfg dict.
    cfg = dict(n_input_dims=6, n_neurons=128, n_hidden_layers=3, n_output_dims=3)

    key = jax.random.PRNGKey(0)
    kx, kw = jax.random.split(key)
    weights = init_mlp_weights(kw, cfg)

    # Case 1: batch divisible by the chosen tile.
    N1 = 512
    x1 = jax.random.normal(kx, (N1, cfg['n_input_dims']), jnp.float32)
    out1 = jax.block_until_ready(mlp_pallas(x1, weights))
    assert out1.shape == (N1, cfg['n_output_dims'])
    assert out1.dtype == jnp.float32
    ref1_bf16 = mlp_ref(x1, weights, matmul_dtype=jnp.bfloat16)
    ref1_f32 = mlp_ref(x1, weights, matmul_dtype=jnp.float32)
    assert jnp.allclose(out1, ref1_bf16, atol=5e-3, rtol=5e-3), \
        "mismatch vs bf16-matched reference (N=512)"
    assert jnp.allclose(out1, ref1_f32, atol=8e-2, rtol=8e-2), \
        "mismatch vs f32 reference (N=512)"

    # Case 2: ragged batch exercising the partial last block (masked writes).
    N2 = 300
    x2 = jax.random.normal(jax.random.fold_in(kx, 1),
                           (N2, cfg['n_input_dims']), jnp.float32)
    out2 = jax.block_until_ready(mlp_pallas(x2, weights))
    assert out2.shape == (N2, cfg['n_output_dims'])
    ref2_bf16 = mlp_ref(x2, weights, matmul_dtype=jnp.bfloat16)
    assert jnp.allclose(out2, ref2_bf16, atol=5e-3, rtol=5e-3), \
        "mismatch vs bf16-matched reference (N=300, ragged)"

    print("KERNEL_OK")
</pallas_src>

<mosaic_0001>
module attributes {stable_mosaic.version = 11 : i64} {
  func.func @kernel(%arg0: i32, %arg1: memref<256x6xf32, #tpu.memory_space<vmem>>, %arg2: memref<6x128xbf16, #tpu.memory_space<vmem>>, %arg3: memref<128x128xbf16, #tpu.memory_space<vmem>>, %arg4: memref<128x128xbf16, #tpu.memory_space<vmem>>, %arg5: memref<128x3xbf16, #tpu.memory_space<vmem>>, %arg6: memref<256x3xf32, #tpu.memory_space<vmem>>) attributes {dimension_semantics = [#tpu.dimension_semantics<parallel>], iteration_bounds = array<i64: 2>, scalar_prefetch = 0 : i64, scratch_operands = 0 : i64, tpu.core_type = #tpu.core_type<tc>, window_params = [{transform_indices = @transform_0, window_bounds = array<i64: 256, 6>}, {pipeline_mode = #tpu.pipeline_mode<synchronous>, transform_indices = @transform_1, window_bounds = array<i64: 6, 128>}, {pipeline_mode = #tpu.pipeline_mode<synchronous>, transform_indices = @transform_2, window_bounds = array<i64: 128, 128>}, {pipeline_mode = #tpu.pipeline_mode<synchronous>, transform_indices = @transform_3, window_bounds = array<i64: 128, 128>}, {pipeline_mode = #tpu.pipeline_mode<synchronous>, transform_indices = @transform_4, window_bounds = array<i64: 128, 3>}, {transform_indices = @transform_5, window_bounds = array<i64: 256, 3>}]} {
    %c0 = arith.constant 0 : index
    %c0_0 = arith.constant 0 : index
    %0 = vector.load %arg1[%c0, %c0_0] : memref<256x6xf32, #tpu.memory_space<vmem>>, vector<256x6xf32>
    %1 = arith.truncf %0 : vector<256x6xf32> to vector<256x6xbf16>
    %c0_1 = arith.constant 0 : index
    %c0_2 = arith.constant 0 : index
    %2 = vector.load %arg2[%c0_1, %c0_2] : memref<6x128xbf16, #tpu.memory_space<vmem>>, vector<6x128xbf16>
    %cst = arith.constant dense<0.000000e+00> : vector<256x128xf32>
    %3 = tpu.matmul %1, %2, %cst {dimension_numbers = #tpu.dot_dimension_numbers<[1], [0], [0], [1], [0, 0, 1, 1], [], []>} : vector<256x6xbf16>, vector<6x128xbf16>, vector<256x128xf32> -> vector<256x128xf32>
    %4 = arith.truncf %3 : vector<256x128xf32> to vector<256x128xbf16>
    %cst_3 = arith.constant 0.000000e+00 : bf16
    %5 = vector.broadcast %cst_3 : bf16 to vector<256x128xbf16>
    %6 = arith.maximumf %4, %5 : vector<256x128xbf16>
    %c0_4 = arith.constant 0 : index
    %c0_5 = arith.constant 0 : index
    %7 = vector.load %arg3[%c0_4, %c0_5] : memref<128x128xbf16, #tpu.memory_space<vmem>>, vector<128x128xbf16>
    %cst_6 = arith.constant dense<0.000000e+00> : vector<256x128xf32>
    %8 = tpu.matmul %6, %7, %cst_6 {dimension_numbers = #tpu.dot_dimension_numbers<[1], [0], [0], [1], [0, 0, 1, 1], [], []>} : vector<256x128xbf16>, vector<128x128xbf16>, vector<256x128xf32> -> vector<256x128xf32>
    %9 = arith.truncf %8 : vector<256x128xf32> to vector<256x128xbf16>
    %cst_7 = arith.constant 0.000000e+00 : bf16
    %10 = vector.broadcast %cst_7 : bf16 to vector<256x128xbf16>
    %11 = arith.maximumf %9, %10 : vector<256x128xbf16>
    %c0_8 = arith.constant 0 : index
    %c0_9 = arith.constant 0 : index
    %12 = vector.load %arg4[%c0_8, %c0_9] : memref<128x128xbf16, #tpu.memory_space<vmem>>, vector<128x128xbf16>
    %cst_10 = arith.constant dense<0.000000e+00> : vector<256x128xf32>
    %13 = tpu.matmul %11, %12, %cst_10 {dimension_numbers = #tpu.dot_dimension_numbers<[1], [0], [0], [1], [0, 0, 1, 1], [], []>} : vector<256x128xbf16>, vector<128x128xbf16>, vector<256x128xf32> -> vector<256x128xf32>
    %14 = arith.truncf %13 : vector<256x128xf32> to vector<256x128xbf16>
    %cst_11 = arith.constant 0.000000e+00 : bf16
    %15 = vector.broadcast %cst_11 : bf16 to vector<256x128xbf16>
    %16 = arith.maximumf %14, %15 : vector<256x128xbf16>
    %c0_12 = arith.constant 0 : index
    %c0_13 = arith.constant 0 : index
    %17 = vector.load %arg5[%c0_12, %c0_13] : memref<128x3xbf16, #tpu.memory_space<vmem>>, vector<128x3xbf16>
    %cst_14 = arith.constant dense<0.000000e+00> : vector<256x3xf32>
    %18 = tpu.matmul %16, %17, %cst_14 {dimension_numbers = #tpu.dot_dimension_numbers<[1], [0], [0], [1], [0, 0, 1, 1], [], []>} : vector<256x128xbf16>, vector<128x3xbf16>, vector<256x3xf32> -> vector<256x3xf32>
    %c0_15 = arith.constant 0 : index
    %c0_16 = arith.constant 0 : index
    %19 = vector.load %arg6[%c0_15, %c0_16] : memref<256x3xf32, #tpu.memory_space<vmem>>, vector<256x3xf32>
    tpu.vector_store %arg6[%c0_15, %c0_16], %18 {strides = array<i32>} : memref<256x3xf32, #tpu.memory_space<vmem>>, vector<256x3xf32>,
    return
  }
  func.func @transform_0(%arg0: i32) -> (i32, i32) {
    %c0_i32 = arith.constant 0 : i32
    %c0_i32_0 = arith.constant 0 : i32
    return %arg0, %c0_i32 : i32, i32
  }
  func.func @transform_1(%arg0: i32) -> (i32, i32) {
    %c0_i32 = arith.constant 0 : i32
    %c0_i32_0 = arith.constant 0 : i32
    %c0_i32_1 = arith.constant 0 : i32
    return %c0_i32, %c0_i32_0 : i32, i32
  }
  func.func @transform_2(%arg0: i32) -> (i32, i32) {
    %c0_i32 = arith.constant 0 : i32
    %c0_i32_0 = arith.constant 0 : i32
    %c0_i32_1 = arith.constant 0 : i32
    return %c0_i32, %c0_i32_0 : i32, i32
  }
  func.func @transform_3(%arg0: i32) -> (i32, i32) {
    %c0_i32 = arith.constant 0 : i32
    %c0_i32_0 = arith.constant 0 : i32
    %c0_i32_1 = arith.constant 0 : i32
    return %c0_i32, %c0_i32_0 : i32, i32
  }
  func.func @transform_4(%arg0: i32) -> (i32, i32) {
    %c0_i32 = arith.constant 0 : i32
    %c0_i32_0 = arith.constant 0 : i32
    %c0_i32_1 = arith.constant 0 : i32
    return %c0_i32, %c0_i32_0 : i32, i32
  }
  func.func @transform_5(%arg0: i32) -> (i32, i32) {
    %c0_i32 = arith.constant 0 : i32
    %c0_i32_0 = arith.constant 0 : i32
    return %arg0, %c0_i32 : i32, i32
  }
}

</mosaic_0001>

<bundles_post_ra>
// kernel: tpu_custom_call.1
= control target key start
LH: loop header
LB: loop body
LE: loop exit
PB: predicated region body
PF: predicated region fallthrough
CT: control target
= control target key end

     0   :  { %s1759_s18 = smov 0   ;;  %s2022_s0 = inlined_call_operand.vmem [shape: f32[512,6], index: 0, kind: input, shape index: {}]   ;;  %s2023_s1 = inlined_call_operand.vmem [shape: bf16[6,128], index: 1, kind: input, shape index: {}]   ;;  %s2024_s2 = inlined_call_operand.vmem [shape: bf16[128,128], index: 2, kind: input, shape index: {}]   ;;  %s2025_s3 = inlined_call_operand.vmem [shape: bf16[128,128], index: 3, kind: input, shape index: {}]   ;;  %s2026_s4 = inlined_call_operand.vmem [shape: bf16[128,3], index: 4, kind: input, shape index: {}]   ;;  %s2027_s5 = inlined_call_operand.vmem [shape: f32[512,3], index: 5, kind: output, shape index: {}]  }
   0x1 LB: > { %s1352_s19 = sadd.s32 4294967295, %s1726_s18   ;;  %p1356_p0 = scmp.ge.s32.totalorder %s1726_s18, 1  ;;  %s1726_s18 = sphi %s1759_s18, %s15_s18  }
   0x2   : > { %p188_p1 = scmp.lt.s32.totalorder %s1726_s18, 3 }
   0x4   : > { %p189_p2 = pnand %p1356_p0, %p188_p1 }
   0x5   : > { %s1357_s22 = sshll.u32 (!%p189_p2), %s1352_s19, 5 }
   0x6   : > { %192 = sbr.rel (%p189_p2) target bundleno = 886 (0x376), region = 40  ;;  %p217_p3 = scmp.lt.s32.totalorder (!%p189_p2), %s1357_s22, 63 }
   0xb   : > { %v277_v0 = vld [vmem:[%s2023_s1] sm:$0x7]  ;;  %vm327_vm0 = vcmask 1042432   ;;  %v1696_v1 = vld [vmem:[%s2024_s2 + $0x38] sm:$0xff]   ;;  %v1697_v3 = vld [vmem:[%s2024_s2 + $0x30] sm:$0xff]   ;;  %s2029_s22 = smov (!%p217_p3, %s1357_s22), 63 }
   0xc   : > { %1686 = vmatprep.subr.msk.bf16.mxu0 %vm327_vm0, %v277_v0  ;;  %v329_v2 = vsel %vm327_vm0, %v277_v0, 0  ;;  %1526 = vmatprep.subr.bf16.mxu1 %v1696_v1  ;;  %v1698_v4 = vld [vmem:[%s2024_s2 + $0x28] sm:$0xff]   ;;  %s1358_s29 = sshll.u32 %s2029_s22, 3  ;;  %v1699_v5 = vld [vmem:[%s2024_s2 + $0x20] sm:$0xff]   ;;  %vm278_vm1 = vcmask 48128   ;;  %v1700_v17 = vld [vmem:[%s2024_s2 + $0x18] sm:$0xff]  }
   0xd   : > { %1493 = vmatpush3.bf16.msra.mxu0 %v329_v2  ;;  %1527 = vmatpush3.bf16.msra.mxu1 %v1696_v1  ;;  %s1787_s7 = scalar_lea.vmem %s2022_s0, %s1358_s29  ;;  %v1701_v55 = vld [vmem:[%s2024_s2 + $0x10] sm:$0xff]   ;;  %v1702_v56 = vld [vmem:[%s2024_s2 + $0x8] sm:$0xff]   ;;  %v1703_v57 = vld [vmem:[%s2024_s2] sm:$0xff]   ;;  %s1953_s8 = scalar_lea.vmem %s2027_s5, %s1358_s29  ;;  %vm1263_vm2 = vcmask 23552  }
   0xe   : > { %1528 = vmatprep.subr.bf16.mxu1 %v1697_v3  ;;  %v229_v6 = vld [vmem:[%s1787_s7] sm:$0xff]  ;;  %v230_v7 = vld [vmem:[%s1787_s7 + $0x8] sm:$0xff]  ;;  %v231_v8 = vld [vmem:[%s1787_s7 + $0x10] sm:$0xff] }
   0xf   : > { %v261_v9 = vpack.c.bf16 %v230_v7, %v229_v6  ;;  %v232_v10 = vld [vmem:[%s1787_s7 + $0x18] sm:$0xff]  ;;  %v233_v11 = vld [vmem:[%s1787_s7 + $0x20] sm:$0xff]  ;;  %v234_v12 = vld [vmem:[%s1787_s7 + $0x28] sm:$0xff] }
  0x10   : > { %v262_v13 = vpack.c.bf16 %v232_v10, %v231_v8  ;;  %v263_v14 = vpack.c.bf16 %v234_v12, %v233_v11  ;;  %v235_v15 = vld [vmem:[%s1787_s7 + $0x30] sm:$0xff]  ;;  %v236_v16 = vld [vmem:[%s1787_s7 + $0x38] sm:$0xff]  ;;  %v237_v18 = vld [vmem:[%s1787_s7 + $0x40] sm:$0xff]  ;;  %v1728_v8 = vmov 0  }
  0x11   : > { %1529 = vmatpush3.bf16.msra.mxu1 %v1697_v3  ;;  %1494 = vmatprep.mubr.msk.bf16.mxu0 %vm278_vm1, %v261_v9  ;;  %v238_v19 = vld [vmem:[%s1787_s7 + $0x48] sm:$0xff]  ;;  %v264_v20 = vpack.c.bf16 %v236_v16, %v235_v15  ;;  %v239_v22 = vld [vmem:[%s1787_s7 + $0x50] sm:$0xff]  ;;  %v240_v23 = vld [vmem:[%s1787_s7 + $0x58] sm:$0xff] }
  0x12   : > { %1530 = vmatprep.subr.bf16.mxu1 %v1698_v4  ;;  %1495 = vmatmul.mubr.msk.bf16.vlgmr.msra.gmra.mxu0 %vm278_vm1, %v262_v13  ;;  %v265_v21 = vpack.c.bf16 %v238_v19, %v237_v18  ;;  %v241_v24 = vld [vmem:[%s1787_s7 + $0x60] sm:$0xff]  ;;  %v242_v25 = vld [vmem:[%s1787_s7 + $0x68] sm:$0xff]  ;;  %v266_v26 = vpack.c.bf16 %v240_v23, %v239_v22  ;;  %v243_v28 = vld [vmem:[%s1787_s7 + $0x70] sm:$0xff] }
  0x13   : > { %1498 = vmatprep.mubr.msk.bf16.mxu0 %vm278_vm1, %v263_v14  ;;  %v267_v27 = vpack.c.bf16 %v242_v25, %v241_v24  ;;  %v244_v29 = vld [vmem:[%s1787_s7 + $0x78] sm:$0xff]  ;;  %v245_v30 = vld [vmem:[%s1787_s7 + $0x80] sm:$0xff]  ;;  %v246_v31 = vld [vmem:[%s1787_s7 + $0x88] sm:$0xff] }
  0x14   : > { %v268_v32 = vpack.c.bf16 %v244_v29, %v243_v28  ;;  %v269_v33 = vpack.c.bf16 %v246_v31, %v245_v30  ;;  %v247_v34 = vld [vmem:[%s1787_s7 + $0x90] sm:$0xff]  ;;  %v248_v35 = vld [vmem:[%s1787_s7 + $0x98] sm:$0xff]  ;;  %v249_v36 = vld [vmem:[%s1787_s7 + $0xa0] sm:$0xff] }
  0x15   : > { %1531 = vmatpush3.bf16.msra.mxu1 %v1698_v4  ;;  %v250_v37 = vld [vmem:[%s1787_s7 + $0xa8] sm:$0xff]  ;;  %v270_v38 = vpack.c.bf16 %v248_v35, %v247_v34  ;;  %v251_v40 = vld [vmem:[%s1787_s7 + $0xb0] sm:$0xff]  ;;  %v252_v41 = vld [vmem:[%s1787_s7 + $0xb8] sm:$0xff] }
  0x16   : > { %1532 = vmatprep.subr.bf16.mxu1 %v1699_v5  ;;  %v271_v39 = vpack.c.bf16 %v250_v37, %v249_v36  ;;  %v253_v42 = vld [vmem:[%s1787_s7 + $0xc0] sm:$0xff]  ;;  %v254_v43 = vld [vmem:[%s1787_s7 + $0xc8] sm:$0xff]  ;;  %v272_v44 = vpack.c.bf16 %v252_v41, %v251_v40  ;;  %v255_v46 = vld [vmem:[%s1787_s7 + $0xd0] sm:$0xff] }
  0x17   : > { %v273_v45 = vpack.c.bf16 %v254_v43, %v253_v42  ;;  %v256_v47 = vld [vmem:[%s1787_s7 + $0xd8] sm:$0xff]  ;;  %v257_v48 = vld [vmem:[%s1787_s7 + $0xe0] sm:$0xff]  ;;  %v258_v49 = vld [vmem:[%s1787_s7 + $0xe8] sm:$0xff] }
  0x18   : > { %v274_v50 = vpack.c.bf16 %v256_v47, %v255_v46  ;;  %v275_v51 = vpack.c.bf16 %v258_v49, %v257_v48  ;;  %v259_v52 = vld [vmem:[%s1787_s7 + $0xf0] sm:$0xff]  ;;  %v260_v53 = vld [vmem:[%s1787_s7 + $0xf8] sm:$0xff]  ;;  %v1706_v60 = vld [vmem:[%s2025_s3 + $0x28] sm:$0xff]  }
  0x19   : > { %1533 = vmatpush3.bf16.msra.mxu1 %v1699_v5  ;;  %v276_v54 = vpack.c.bf16 %v260_v53, %v259_v52  ;;  %v1704_v58 = vld [vmem:[%s2025_s3 + $0x38] sm:$0xff]   ;;  %v1705_v59 = vld [vmem:[%s2025_s3 + $0x30] sm:$0xff]   ;;  %v1707_v61 = vld [vmem:[%s2025_s3 + $0x20] sm:$0xff]  }
  0x1a   : > { %1534 = vmatprep.subr.bf16.mxu1 %v1700_v17  ;;  %1499 = vmatmul.mubr.msk.bf16.gmra.mxu0 %vm278_vm1, %v264_v20  ;;  %v1708_v62 = vld [vmem:[%s2025_s3 + $0x18] sm:$0xff]   ;;  %v1709_v63 = vld [vmem:[%s2025_s3 + $0x10] sm:$0xff]   ;;  %v1710_v0 = vld [vmem:[%s2025_s3 + $0x8] sm:$0xff]  }
  0x1b   : > { %1502 = vmatprep.mubr.msk.bf16.mxu0 %vm278_vm1, %v265_v21  ;;  %1574 = vmatprep.subr.bf16.mxu0 %v1704_v58 }
  0x1c   : > { %1575 = vmatpush3.bf16.msra.mxu0 %v1704_v58 }
  0x1d   : > { %1535 = vmatpush3.bf16.msra.mxu1 %v1700_v17  ;;  %1576 = vmatprep.subr.bf16.mxu0 %v1705_v59 }
  0x1e   : > { %1536 = vmatprep.subr.bf16.mxu1 %v1701_v55 }
  0x20   : > { %1577 = vmatpush3.bf16.msra.mxu0 %v1705_v59 }
  0x21   : > { %1537 = vmatpush3.bf16.msra.mxu1 %v1701_v55  ;;  %1578 = vmatprep.subr.bf16.mxu0 %v1706_v60 }
  0x22   : > { %1503 = vmatmul.mubr.msk.bf16.gmra.mxu0 %vm278_vm1, %v266_v26  ;;  %1538 = vmatprep.subr.bf16.mxu1 %v1702_v56 }
  0x23   : > { %1506 = vmatprep.mubr.msk.bf16.mxu0 %vm278_vm1, %v267_v27 }
  0x24   : > { %1579 = vmatpush3.bf16.msra.mxu0 %v1706_v60 }
  0x25   : > { %1539 = vmatpush3.bf16.msra.mxu1 %v1702_v56  ;;  %1580 = vmatprep.subr.bf16.mxu0 %v1707_v61 }
  0x26   : > { %1540 = vmatprep.subr.bf16.mxu1 %v1703_v57 }
  0x28   : > { %1581 = vmatpush3.bf16.msra.mxu0 %v1707_v61 }
  0x29   : > { %1541 = vmatpush3.bf16.msra.mxu1 %v1703_v57  ;;  %1582 = vmatprep.subr.bf16.mxu0 %v1708_v62 }
  0x2a   : > { %1507 = vmatmul.mubr.msk.bf16.gmra.mxu0 %vm278_vm1, %v268_v32 }
  0x2b   : > { %1510 = vmatprep.mubr.msk.bf16.mxu0 %vm278_vm1, %v269_v33 }
  0x2c   : > { %1583 = vmatpush3.bf16.msra.mxu0 %v1708_v62 }
  0x2d   : > { %1584 = vmatprep.subr.bf16.mxu0 %v1709_v63 }
  0x30   : > { %1585 = vmatpush3.bf16.msra.mxu0 %v1709_v63 }
  0x31   : > { %1586 = vmatprep.subr.bf16.mxu0 %v1710_v0 }
  0x32   : > { %1511 = vmatmul.mubr.msk.bf16.gmra.mxu0 %vm278_vm1, %v270_v38 }
  0x33   : > { %1514 = vmatprep.mubr.msk.bf16.mxu0 %vm278_vm1, %v271_v39 }
  0x34   : > { %1587 = vmatpush3.bf16.msra.mxu0 %v1710_v0 }
  0x3a   : > { %1515 = vmatmul.mubr.msk.bf16.gmra.mxu0 %vm278_vm1, %v272_v44 }
  0x3b   : > { %1518 = vmatprep.mubr.msk.bf16.mxu0 %vm278_vm1, %v273_v45 }
  0x42   : > { %1519 = vmatmul.mubr.msk.bf16.gmra.mxu0 %vm278_vm1, %v274_v50 }
  0x43   : > { %1522 = vmatprep.mubr.msk.bf16.mxu0 %vm278_vm1, %v275_v51 }
  0x4a   : > { %1523 = vmatmul.mubr.msk.bf16.gmra.mxu0 %vm278_vm1, %v276_v54 }
  0xd2   : > { %v1496_v1 = vpop.f32.mrf.mxu0 }
  0xd4   : > { %v365_v2 = vpop.f32.mrf.mxu0 }
  0xd6   : > { %v1497_v3 = vpop.f32.mrf.mxu0 }
  0xd7   : > { %v493_v4 = vpack.c.bf16 %v1497_v3, %v1496_v1  ;;  %v1712_v3 = vld [vmem:[%s2026_s4 + $0x38] sm:$0xff]  }
  0xd8   : > { %v368_v5 = vpop.f32.mrf.mxu0  ;;  %1670 = vmatprep.subr.bf16.mxu1 %v1712_v3 }
  0xd9   : > { %v492_v6 = vpack.c.bf16 %v368_v5, %v365_v2  ;;  %v509_v10 = vmax.bf16 %v1728_v8, %v493_v4  ;;  %v1711_v2 = vld [vmem:[%s2025_s3] sm:$0xff]   ;;  %v1713_v4 = vld [vmem:[%s2026_s4 + $0x30] sm:$0xff]   ;;  %v1714_v5 = vld [vmem:[%s2026_s4 + $0x28] sm:$0xff]  }
  0xda   : > { %v1500_v7 = vpop.f32.mrf.mxu0  ;;  %1588 = vmatprep.subr.bf16.mxu0 %v1711_v2 }
  0xdb   : > { %v508_v9 = vmax.bf16 %v1728_v8, %v492_v6  ;;  %1589 = vmatpush3.bf16.msra.mxu0 %v1711_v2  ;;  %v1715_v6 = vld [vmem:[%s2026_s4 + $0x20] sm:$0xff]  }
  0xdc   : > { %v381_v11 = vpop.f32.mrf.mxu0  ;;  %1622 = vmatprep.subr.bf16.mxu0 %v1712_v3 }
  0xdd   : > { %1542 = vmatprep.mubr.bf16.mxu1 %v508_v9  ;;  %v1717_v9 = vld [vmem:[%s2026_s4 + $0x10] sm:$0xff]  }
  0xde   : > { %v1501_v12 = vpop.f32.mrf.mxu0  ;;  %1543 = vmatmul.mubr.bf16.vlgmr.msra.gmra.mxu1 %v509_v10 }
  0xdf   : > { %v495_v13 = vpack.c.bf16 %v1501_v12, %v1500_v7  ;;  %1678 = vmatpush3.bf16.msra.mxu1 %v1712_v3  ;;  %v1716_v7 = vld [vmem:[%s2026_s4 + $0x18] sm:$0xff]  }
  0xe0   : > { %v384_v14 = vpop.f32.mrf.mxu0  ;;  %1671 = vmatprep.subr.bf16.mxu1 %v1713_v4 }
  0xe1   : > { %v494_v15 = vpack.c.bf16 %v384_v14, %v381_v11  ;;  %v511_v18 = vmax.bf16 %v1728_v8, %v495_v13 }
  0xe2   : > { %v1504_v16 = vpop.f32.mrf.mxu0 }
  0xe3   : > { %v510_v17 = vmax.bf16 %v1728_v8, %v494_v15  ;;  %1679 = vmatpush3.bf16.msra.mxu1 %v1713_v4 }
  0xe4   : > { %v397_v19 = vpop.f32.mrf.mxu0  ;;  %1672 = vmatprep.subr.bf16.mxu1 %v1714_v5 }
  0xe5   : > { %1546 = vmatprep.mubr.bf16.mxu1 %v510_v17 }
  0xe6   : > { %v1505_v20 = vpop.f32.mrf.mxu0  ;;  %1547 = vmatmul.mubr.bf16.gmra.mxu1 %v511_v18 }
  0xe7   : > { %v497_v21 = vpack.c.bf16 %v1505_v20, %v1504_v16  ;;  %1680 = vmatpush3.bf16.msra.mxu1 %v1714_v5 }
  0xe8   : > { %v400_v22 = vpop.f32.mrf.mxu0  ;;  %1673 = vmatprep.subr.bf16.mxu1 %v1715_v6 }
  0xe9   : > { %v496_v23 = vpack.c.bf16 %v400_v22, %v397_v19  ;;  %v513_v26 = vmax.bf16 %v1728_v8, %v497_v21 }
  0xea   : > { %v1508_v24 = vpop.f32.mrf.mxu0 }
  0xeb   : > { %v512_v25 = vmax.bf16 %v1728_v8, %v496_v23  ;;  %1681 = vmatpush3.bf16.msra.mxu1 %v1715_v6 }
  0xec   : > { %v413_v27 = vpop.f32.mrf.mxu0  ;;  %1674 = vmatprep.subr.bf16.mxu1 %v1716_v7 }
  0xed   : > { %1550 = vmatprep.mubr.bf16.mxu1 %v512_v25 }
  0xee   : > { %v1509_v28 = vpop.f32.mrf.mxu0  ;;  %1551 = vmatmul.mubr.bf16.gmra.mxu1 %v513_v26 }
  0xef   : > { %v499_v29 = vpack.c.bf16 %v1509_v28, %v1508_v24  ;;  %1682 = vmatpush3.bf16.msra.mxu1 %v1716_v7 }
  0xf0   : > { %v416_v30 = vpop.f32.mrf.mxu0  ;;  %1675 = vmatprep.subr.bf16.mxu1 %v1717_v9 }
  0xf1   : > { %v498_v31 = vpack.c.bf16 %v416_v30, %v413_v27  ;;  %v515_v34 = vmax.bf16 %v1728_v8, %v499_v29 }
  0xf2   : > { %v1512_v32 = vpop.f32.mrf.mxu0 }
  0xf3   : > { %v514_v33 = vmax.bf16 %v1728_v8, %v498_v31  ;;  %1683 = vmatpush3.bf16.msra.mxu1 %v1717_v9 }
  0xf4   : > { %v429_v35 = vpop.f32.mrf.mxu0 }
  0xf5   : > { %1554 = vmatprep.mubr.bf16.mxu1 %v514_v33 }
  0xf6   : > { %v1513_v36 = vpop.f32.mrf.mxu0  ;;  %1555 = vmatmul.mubr.bf16.gmra.mxu1 %v515_v34 }
  0xf7   : > { %v501_v37 = vpack.c.bf16 %v1513_v36, %v1512_v32 }
  0xf8   : > { %v432_v38 = vpop.f32.mrf.mxu0 }
  0xf9   : > { %v500_v39 = vpack.c.bf16 %v432_v38, %v429_v35  ;;  %v517_v42 = vmax.bf16 %v1728_v8, %v501_v37 }
  0xfa   : > { %v1516_v40 = vpop.f32.mrf.mxu0 }
  0xfb   : > { %v516_v41 = vmax.bf16 %v1728_v8, %v500_v39 }
  0xfc   : > { %v445_v43 = vpop.f32.mrf.mxu0 }
  0xfd   : > { %1558 = vmatprep.mubr.bf16.mxu1 %v516_v41 }
  0xfe   : > { %v1517_v44 = vpop.f32.mrf.mxu0  ;;  %1559 = vmatmul.mubr.bf16.gmra.mxu1 %v517_v42 }
  0xff   : > { %v503_v45 = vpack.c.bf16 %v1517_v44, %v1516_v40 }
 0x100   : > { %v448_v46 = vpop.f32.mrf.mxu0 }
 0x101   : > { %v502_v47 = vpack.c.bf16 %v448_v46, %v445_v43  ;;  %v519_v50 = vmax.bf16 %v1728_v8, %v503_v45 }
 0x102   : > { %v1520_v48 = vpop.f32.mrf.mxu0 }
 0x103   : > { %v518_v49 = vmax.bf16 %v1728_v8, %v502_v47 }
 0x104   : > { %v461_v51 = vpop.f32.mrf.mxu0 }
 0x105   : > { %1562 = vmatprep.mubr.bf16.mxu1 %v518_v49 }
 0x106   : > { %v1521_v52 = vpop.f32.mrf.mxu0  ;;  %1563 = vmatmul.mubr.bf16.gmra.mxu1 %v519_v50 }
 0x107   : > { %v505_v53 = vpack.c.bf16 %v1521_v52, %v1520_v48 }
 0x108   : > { %v464_v54 = vpop.f32.mrf.mxu0 }
 0x109   : > { %v504_v55 = vpack.c.bf16 %v464_v54, %v461_v51  ;;  %v521_v58 = vmax.bf16 %v1728_v8, %v505_v53 }
 0x10a   : > { %v1524_v56 = vpop.f32.mrf.mxu0 }
 0x10b   : > { %v520_v57 = vmax.bf16 %v1728_v8, %v504_v55 }
 0x10c   : > { %v477_v59 = vpop.f32.mrf.mxu0 }
 0x10d   : > { %1566 = vmatprep.mubr.bf16.mxu1 %v520_v57 }
 0x10e   : > { %v1525_v60 = vpop.f32.mrf.mxu0  ;;  %1567 = vmatmul.mubr.bf16.gmra.mxu1 %v521_v58 }
 0x10f   : > { %v507_v61 = vpack.c.bf16 %v1525_v60, %v1524_v56 }
 0x110   : > { %v480_v62 = vpop.f32.mrf.mxu0 }
 0x111   : > { %v506_v63 = vpack.c.bf16 %v480_v62, %v477_v59  ;;  %v523_v1 = vmax.bf16 %v1728_v8, %v507_v61 }
 0x113   : > { %v522_v0 = vmax.bf16 %v1728_v8, %v506_v63 }
 0x115   : > { %1570 = vmatprep.mubr.bf16.mxu1 %v522_v0 }
 0x116   : > { %1571 = vmatmul.mubr.bf16.gmra.mxu1 %v523_v1 }
 0x19e   : > { %v1544_v10 = vpop.f32.mrf.mxu1 }
 0x1a0   : > { %v622_v11 = vpop.f32.mrf.mxu1 }
 0x1a2   : > { %v1545_v12 = vpop.f32.mrf.mxu1 }
 0x1a3   : > { %v750_v13 = vpack.c.bf16 %v1545_v12, %v1544_v10  ;;  %v1719_v12 = vld [vmem:[%s2026_s4] sm:$0xff]  }
 0x1a4   : > { %v625_v14 = vpop.f32.mrf.mxu1 }
 0x1a5   : > { %v749_v15 = vpack.c.bf16 %v625_v14, %v622_v11  ;;  %v766_v18 = vmax.bf16 %v1728_v8, %v750_v13  ;;  %v1718_v11 = vld [vmem:[%s2026_s4 + $0x8] sm:$0xff]  }
 0x1a6   : > { %v1548_v16 = vpop.f32.mrf.mxu1  ;;  %1676 = vmatprep.subr.bf16.mxu1 %v1718_v11 }
 0x1a7   : > { %v765_v17 = vmax.bf16 %v1728_v8, %v749_v15  ;;  %1684 = vmatpush3.bf16.msra.mxu1 %v1718_v11 }
 0x1a8   : > { %v638_v19 = vpop.f32.mrf.mxu1  ;;  %1677 = vmatprep.subr.bf16.mxu1 %v1719_v12 }
 0x1a9   : > { %1590 = vmatprep.mubr.bf16.mxu0 %v765_v17 }
 0x1aa   : > { %v1549_v20 = vpop.f32.mrf.mxu1  ;;  %1591 = vmatmul.mubr.bf16.vlgmr.msra.gmra.mxu0 %v766_v18 }
 0x1ab   : > { %1623 = vmatpush3.bf16.msra.mxu0 %v1712_v3  ;;  %v752_v21 = vpack.c.bf16 %v1549_v20, %v1548_v16  ;;  %1685 = vmatpush3.bf16.msra.mxu1 %v1719_v12 }
 0x1ac   : > { %v641_v22 = vpop.f32.mrf.mxu1  ;;  %1624 = vmatprep.subr.bf16.mxu0 %v1713_v4 }
 0x1ad   : > { %v751_v23 = vpack.c.bf16 %v641_v22, %v638_v19  ;;  %v768_v26 = vmax.bf16 %v1728_v8, %v752_v21 }
 0x1ae   : > { %v1552_v24 = vpop.f32.mrf.mxu1 }
 0x1af   : > { %v767_v25 = vmax.bf16 %v1728_v8, %v751_v23  ;;  %1625 = vmatpush3.bf16.msra.mxu0 %v1713_v4 }
 0x1b0   : > { %v654_v27 = vpop.f32.mrf.mxu1  ;;  %1626 = vmatprep.subr.bf16.mxu0 %v1714_v5 }
 0x1b1   : > { %1594 = vmatprep.mubr.bf16.mxu0 %v767_v25 }
 0x1b2   : > { %v1553_v28 = vpop.f32.mrf.mxu1  ;;  %1595 = vmatmul.mubr.bf16.gmra.mxu0 %v768_v26 }
 0x1b3   : > { %1627 = vmatpush3.bf16.msra.mxu0 %v1714_v5  ;;  %v754_v29 = vpack.c.bf16 %v1553_v28, %v1552_v24 }
 0x1b4   : > { %v657_v30 = vpop.f32.mrf.mxu1  ;;  %1628 = vmatprep.subr.bf16.mxu0 %v1715_v6 }
 0x1b5   : > { %v753_v31 = vpack.c.bf16 %v657_v30, %v654_v27  ;;  %v770_v34 = vmax.bf16 %v1728_v8, %v754_v29 }
 0x1b6   : > { %v1556_v32 = vpop.f32.mrf.mxu1 }
 0x1b7   : > { %v769_v33 = vmax.bf16 %v1728_v8, %v753_v31  ;;  %1629 = vmatpush3.bf16.msra.mxu0 %v1715_v6 }
 0x1b8   : > { %v670_v35 = vpop.f32.mrf.mxu1  ;;  %1630 = vmatprep.subr.bf16.mxu0 %v1716_v7 }
 0x1b9   : > { %1598 = vmatprep.mubr.bf16.mxu0 %v769_v33 }
 0x1ba   : > { %v1557_v36 = vpop.f32.mrf.mxu1  ;;  %1599 = vmatmul.mubr.bf16.gmra.mxu0 %v770_v34 }
 0x1bb   : > { %1631 = vmatpush3.bf16.msra.mxu0 %v1716_v7  ;;  %v756_v37 = vpack.c.bf16 %v1557_v36, %v1556_v32 }
 0x1bc   : > { %v673_v38 = vpop.f32.mrf.mxu1  ;;  %1632 = vmatprep.subr.bf16.mxu0 %v1717_v9 }
 0x1bd   : > { %v755_v39 = vpack.c.bf16 %v673_v38, %v670_v35  ;;  %v772_v42 = vmax.bf16 %v1728_v8, %v756_v37 }
 0x1be   : > { %v1560_v40 = vpop.f32.mrf.mxu1 }
 0x1bf   : > { %v771_v41 = vmax.bf16 %v1728_v8, %v755_v39  ;;  %1633 = vmatpush3.bf16.msra.mxu0 %v1717_v9 }
 0x1c0   : > { %v686_v43 = vpop.f32.mrf.mxu1  ;;  %1634 = vmatprep.subr.bf16.mxu0 %v1718_v11 }
 0x1c1   : > { %1602 = vmatprep.mubr.bf16.mxu0 %v771_v41 }
 0x1c2   : > { %v1561_v44 = vpop.f32.mrf.mxu1  ;;  %1603 = vmatmul.mubr.bf16.gmra.mxu0 %v772_v42 }
 0x1c3   : > { %v758_v45 = vpack.c.bf16 %v1561_v44, %v1560_v40  ;;  %1635 = vmatpush3.bf16.msra.mxu0 %v1718_v11 }
 0x1c4   : > { %v689_v46 = vpop.f32.mrf.mxu1  ;;  %1636 = vmatprep.subr.bf16.mxu0 %v1719_v12 }
 0x1c5   : > { %v757_v47 = vpack.c.bf16 %v689_v46, %v686_v43  ;;  %v774_v50 = vmax.bf16 %v1728_v8, %v758_v45 }
 0x1c6   : > { %v1564_v48 = vpop.f32.mrf.mxu1 }
 0x1c7   : > { %v773_v49 = vmax.bf16 %v1728_v8, %v757_v47  ;;  %1637 = vmatpush3.bf16.msra.mxu0 %v1719_v12 }
 0x1c8   : > { %v702_v51 = vpop.f32.mrf.mxu1 }
 0x1c9   : > { %1606 = vmatprep.mubr.bf16.mxu0 %v773_v49 }
 0x1ca   : > { %v1565_v52 = vpop.f32.mrf.mxu1  ;;  %1607 = vmatmul.mubr.bf16.gmra.mxu0 %v774_v50 }
 0x1cb   : > { %v760_v53 = vpack.c.bf16 %v1565_v52, %v1564_v48 }
 0x1cc   : > { %v705_v54 = vpop.f32.mrf.mxu1 }
 0x1cd   : > { %v759_v55 = vpack.c.bf16 %v705_v54, %v702_v51  ;;  %v776_v58 = vmax.bf16 %v1728_v8, %v760_v53 }
 0x1ce   : > { %v1568_v56 = vpop.f32.mrf.mxu1 }
 0x1cf   : > { %v775_v57 = vmax.bf16 %v1728_v8, %v759_v55 }
 0x1d0   : > { %v718_v59 = vpop.f32.mrf.mxu1 }
 0x1d1   : > { %1610 = vmatprep.mubr.bf16.mxu0 %v775_v57 }
 0x1d2   : > { %v1569_v60 = vpop.f32.mrf.mxu1  ;;  %1611 = vmatmul.mubr.bf16.gmra.mxu0 %v776_v58 }
 0x1d3   : > { %v762_v61 = vpack.c.bf16 %v1569_v60, %v1568_v56 }
 0x1d4   : > { %v721_v62 = vpop.f32.mrf.mxu1 }
 0x1d5   : > { %v761_v63 = vpack.c.bf16 %v721_v62, %v718_v59  ;;  %v778_v2 = vmax.bf16 %v1728_v8, %v762_v61 }
 0x1d6   : > { %v1572_v0 = vpop.f32.mrf.mxu1 }
 0x1d7   : > { %v777_v1 = vmax.bf16 %v1728_v8, %v761_v63 }
 0x1d8   : > { %v734_v3 = vpop.f32.mrf.mxu1 }
 0x1d9   : > { %1614 = vmatprep.mubr.bf16.mxu0 %v777_v1 }
 0x1da   : > { %v1573_v4 = vpop.f32.mrf.mxu1  ;;  %1615 = vmatmul.mubr.bf16.gmra.mxu0 %v778_v2 }
 0x1db   : > { %v764_v5 = vpack.c.bf16 %v1573_v4, %v1572_v0 }
 0x1dc   : > { %v737_v6 = vpop.f32.mrf.mxu1 }
 0x1dd   : > { %v763_v7 = vpack.c.bf16 %v737_v6, %v734_v3  ;;  %v780_v10 = vmax.bf16 %v1728_v8, %v764_v5 }
 0x1df   : > { %v779_v9 = vmax.bf16 %v1728_v8, %v763_v7 }
 0x1e1   : > { %1618 = vmatprep.mubr.bf16.mxu0 %v779_v9 }
 0x1e2   : > { %1619 = vmatmul.mubr.bf16.gmra.mxu0 %v780_v10 }
 0x26a   : > { %v1592_v13 = vpop.f32.mrf.mxu0 }
 0x26c   : > { %v879_v14 = vpop.f32.mrf.mxu0 }
 0x26e   : > { %v1593_v15 = vpop.f32.mrf.mxu0 }
 0x26f   : > { %v1007_v16 = vpack.c.bf16 %v1593_v15, %v1592_v13 }
 0x270   : > { %v882_v17 = vpop.f32.mrf.mxu0 }
 0x271   : > { %v1006_v18 = vpack.c.bf16 %v882_v17, %v879_v14  ;;  %v1023_v21 = vmax.bf16 %v1728_v8, %v1007_v16 }
 0x272   : > { %v1596_v19 = vpop.f32.mrf.mxu0 }
 0x273   : > { %v1022_v20 = vmax.bf16 %v1728_v8, %v1006_v18 }
 0x274   : > { %v895_v22 = vpop.f32.mrf.mxu0 }
 0x275   : > { %1638 = vmatprep.mubr.bf16.mxu0 %v1022_v20 }
 0x276   : > { %v1597_v23 = vpop.f32.mrf.mxu0  ;;  %1639 = vmatmul.mubr.bf16.vlgmr.msra.gmra.mxu0 %v1023_v21 }
 0x277   : > { %v1009_v24 = vpack.c.bf16 %v1597_v23, %v1596_v19 }
 0x278   : > { %v898_v25 = vpop.f32.mrf.mxu0 }
 0x279   : > { %v1008_v26 = vpack.c.bf16 %v898_v25, %v895_v22  ;;  %v1025_v29 = vmax.bf16 %v1728_v8, %v1009_v24 }
 0x27a   : > { %v1600_v27 = vpop.f32.mrf.mxu0 }
 0x27b   : > { %v1024_v28 = vmax.bf16 %v1728_v8, %v1008_v26 }
 0x27c   : > { %v911_v30 = vpop.f32.mrf.mxu0 }
 0x27d   : > { %1642 = vmatprep.mubr.bf16.mxu1 %v1024_v28 }
 0x27e   : > { %v1601_v31 = vpop.f32.mrf.mxu0  ;;  %1643 = vmatmul.mubr.bf16.vlgmr.msra.gmra.mxu1 %v1025_v29 }
 0x27f   : > { %v1011_v32 = vpack.c.bf16 %v1601_v31, %v1600_v27 }
 0x280   : > { %v914_v33 = vpop.f32.mrf.mxu0 }
 0x281   : > { %v1010_v34 = vpack.c.bf16 %v914_v33, %v911_v30  ;;  %v1027_v37 = vmax.bf16 %v1728_v8, %v1011_v32 }
 0x282   : > { %v1604_v35 = vpop.f32.mrf.mxu0 }
 0x283   : > { %v1026_v36 = vmax.bf16 %v1728_v8, %v1010_v34 }
 0x284   : > { %v927_v38 = vpop.f32.mrf.mxu0 }
 0x285   : > { %1646 = vmatprep.mubr.bf16.mxu1 %v1026_v36 }
 0x286   : > { %v1605_v39 = vpop.f32.mrf.mxu0  ;;  %1647 = vmatmul.mubr.bf16.gmra.mxu1 %v1027_v37 }
 0x287   : > { %v1013_v40 = vpack.c.bf16 %v1605_v39, %v1604_v35 }
 0x288   : > { %v930_v41 = vpop.f32.mrf.mxu0 }
 0x289   : > { %v1012_v42 = vpack.c.bf16 %v930_v41, %v927_v38  ;;  %v1029_v45 = vmax.bf16 %v1728_v8, %v1013_v40 }
 0x28a   : > { %v1608_v43 = vpop.f32.mrf.mxu0 }
 0x28b   : > { %v1028_v44 = vmax.bf16 %v1728_v8, %v1012_v42 }
 0x28c   : > { %v943_v46 = vpop.f32.mrf.mxu0 }
 0x28d   : > { %1650 = vmatprep.mubr.bf16.mxu1 %v1028_v44 }
 0x28e   : > { %v1609_v47 = vpop.f32.mrf.mxu0  ;;  %1651 = vmatmul.mubr.bf16.gmra.mxu1 %v1029_v45 }
 0x28f   : > { %v1015_v48 = vpack.c.bf16 %v1609_v47, %v1608_v43 }
 0x290   : > { %v946_v49 = vpop.f32.mrf.mxu0 }
 0x291   : > { %v1014_v50 = vpack.c.bf16 %v946_v49, %v943_v46  ;;  %v1031_v53 = vmax.bf16 %v1728_v8, %v1015_v48 }
 0x292   : > { %v1612_v51 = vpop.f32.mrf.mxu0 }
 0x293   : > { %v1030_v52 = vmax.bf16 %v1728_v8, %v1014_v50 }
 0x294   : > { %v959_v54 = vpop.f32.mrf.mxu0 }
 0x295   : > { %1654 = vmatprep.mubr.bf16.mxu1 %v1030_v52 }
 0x296   : > { %v1613_v55 = vpop.f32.mrf.mxu0  ;;  %1655 = vmatmul.mubr.bf16.gmra.mxu1 %v1031_v53 }
 0x297   : > { %v1017_v56 = vpack.c.bf16 %v1613_v55, %v1612_v51 }
 0x298   : > { %v962_v57 = vpop.f32.mrf.mxu0 }
 0x299   : > { %v1016_v58 = vpack.c.bf16 %v962_v57, %v959_v54  ;;  %v1033_v61 = vmax.bf16 %v1728_v8, %v1017_v56 }
 0x29a   : > { %v1616_v59 = vpop.f32.mrf.mxu0 }
 0x29b   : > { %v1032_v60 = vmax.bf16 %v1728_v8, %v1016_v58 }
 0x29c   : > { %v975_v62 = vpop.f32.mrf.mxu0 }
 0x29d   : > { %1658 = vmatprep.mubr.bf16.mxu1 %v1032_v60 }
 0x29e   : > { %v1617_v63 = vpop.f32.mrf.mxu0  ;;  %1659 = vmatmul.mubr.bf16.gmra.mxu1 %v1033_v61 }
 0x29f   : > { %v1019_v0 = vpack.c.bf16 %v1617_v63, %v1616_v59 }
 0x2a0   : > { %v978_v1 = vpop.f32.mrf.mxu0 }
 0x2a1   : > { %v1018_v2 = vpack.c.bf16 %v978_v1, %v975_v62  ;;  %v1035_v5 = vmax.bf16 %v1728_v8, %v1019_v0 }
 0x2a2   : > { %v1620_v3 = vpop.f32.mrf.mxu0 }
 0x2a3   : > { %v1034_v4 = vmax.bf16 %v1728_v8, %v1018_v2 }
 0x2a4   : > { %v991_v6 = vpop.f32.mrf.mxu0 }
 0x2a5   : > { %1662 = vmatprep.mubr.bf16.mxu1 %v1034_v4 }
 0x2a6   : > { %v1621_v7 = vpop.f32.mrf.mxu0  ;;  %1663 = vmatmul.mubr.bf16.gmra.mxu1 %v1035_v5 }
 0x2a7   : > { %v1021_v9 = vpack.c.bf16 %v1621_v7, %v1620_v3 }
 0x2a8   : > { %v994_v10 = vpop.f32.mrf.mxu0 }
 0x2a9   : > { %v1020_v11 = vpack.c.bf16 %v994_v10, %v991_v6  ;;  %v1037_v13 = vmax.bf16 %v1728_v8, %v1021_v9 }
 0x2ab   : > { %v1036_v12 = vmax.bf16 %v1728_v8, %v1020_v11 }
 0x2ad   : > { %1666 = vmatprep.mubr.bf16.mxu1 %v1036_v12 }
 0x2ae   : > { %1667 = vmatmul.mubr.bf16.gmra.mxu1 %v1037_v13 }
 0x336   : > { %v1640_v14 = vpop.f32.mrf.mxu0 }
 0x337   : > { %1266 = vst.msk [vmem:[%s1953_s8 + $0x10] sm:$0xff] %vm1263_vm2, %v1640_v14 }
 0x338   : > { %v1136_v8 = vpop.f32.mrf.mxu0 }
 0x339   : > { %1264 = vst.msk [vmem:[%s1953_s8] sm:$0xff] %vm1263_vm2, %v1136_v8 }
 0x33a   : > { %v1641_v15 = vpop.f32.mrf.mxu0 }
 0x33b   : > { %1267 = vst.msk [vmem:[%s1953_s8 + $0x18] sm:$0xff] %vm1263_vm2, %v1641_v15 }
 0x33c   : > { %v1139_v16 = vpop.f32.mrf.mxu0 }
 0x33d   : > { %1265 = vst.msk [vmem:[%s1953_s8 + $0x8] sm:$0xff] %vm1263_vm2, %v1139_v16 }
 0x33e   : > { %v1644_v17 = vpop.f32.mrf.mxu1 }
 0x33f   : > { %1270 = vst.msk [vmem:[%s1953_s8 + $0x30] sm:$0xff] %vm1263_vm2, %v1644_v17 }
 0x340   : > { %v1152_v18 = vpop.f32.mrf.mxu1 }
 0x341   : > { %1268 = vst.msk [vmem:[%s1953_s8 + $0x20] sm:$0xff] %vm1263_vm2, %v1152_v18 }
 0x342   : > { %v1645_v19 = vpop.f32.mrf.mxu1 }
 0x343   : > { %1271 = vst.msk [vmem:[%s1953_s8 + $0x38] sm:$0xff] %vm1263_vm2, %v1645_v19 }
 0x344   : > { %v1155_v20 = vpop.f32.mrf.mxu1 }
 0x345   : > { %1269 = vst.msk [vmem:[%s1953_s8 + $0x28] sm:$0xff] %vm1263_vm2, %v1155_v20 }
 0x346   : > { %v1648_v21 = vpop.f32.mrf.mxu1 }
 0x347   : > { %1274 = vst.msk [vmem:[%s1953_s8 + $0x50] sm:$0xff] %vm1263_vm2, %v1648_v21 }
 0x348   : > { %v1168_v22 = vpop.f32.mrf.mxu1 }
 0x349   : > { %1272 = vst.msk [vmem:[%s1953_s8 + $0x40] sm:$0xff] %vm1263_vm2, %v1168_v22 }
 0x34a   : > { %v1649_v23 = vpop.f32.mrf.mxu1 }
 0x34b   : > { %1275 = vst.msk [vmem:[%s1953_s8 + $0x58] sm:$0xff] %vm1263_vm2, %v1649_v23 }
 0x34c   : > { %v1171_v24 = vpop.f32.mrf.mxu1 }
 0x34d   : > { %1273 = vst.msk [vmem:[%s1953_s8 + $0x48] sm:$0xff] %vm1263_vm2, %v1171_v24 }
 0x34e   : > { %v1652_v25 = vpop.f32.mrf.mxu1 }
 0x34f   : > { %1278 = vst.msk [vmem:[%s1953_s8 + $0x70] sm:$0xff] %vm1263_vm2, %v1652_v25 }
 0x350   : > { %v1184_v26 = vpop.f32.mrf.mxu1 }
 0x351   : > { %1276 = vst.msk [vmem:[%s1953_s8 + $0x60] sm:$0xff] %vm1263_vm2, %v1184_v26 }
 0x352   : > { %v1653_v27 = vpop.f32.mrf.mxu1 }
 0x353   : > { %1279 = vst.msk [vmem:[%s1953_s8 + $0x78] sm:$0xff] %vm1263_vm2, %v1653_v27 }
 0x354   : > { %v1187_v28 = vpop.f32.mrf.mxu1 }
 0x355   : > { %1277 = vst.msk [vmem:[%s1953_s8 + $0x68] sm:$0xff] %vm1263_vm2, %v1187_v28 }
 0x356   : > { %v1656_v29 = vpop.f32.mrf.mxu1 }
 0x357   : > { %1282 = vst.msk [vmem:[%s1953_s8 + $0x90] sm:$0xff] %vm1263_vm2, %v1656_v29 }
 0x358   : > { %v1200_v30 = vpop.f32.mrf.mxu1 }
 0x359   : > { %1280 = vst.msk [vmem:[%s1953_s8 + $0x80] sm:$0xff] %vm1263_vm2, %v1200_v30 }
 0x35a   : > { %v1657_v31 = vpop.f32.mrf.mxu1 }
 0x35b   : > { %1283 = vst.msk [vmem:[%s1953_s8 + $0x98] sm:$0xff] %vm1263_vm2, %v1657_v31 }
 0x35c   : > { %v1203_v32 = vpop.f32.mrf.mxu1 }
 0x35d   : > { %1281 = vst.msk [vmem:[%s1953_s8 + $0x88] sm:$0xff] %vm1263_vm2, %v1203_v32 }
 0x35e   : > { %v1660_v33 = vpop.f32.mrf.mxu1 }
 0x35f   : > { %1286 = vst.msk [vmem:[%s1953_s8 + $0xb0] sm:$0xff] %vm1263_vm2, %v1660_v33 }
 0x360   : > { %v1216_v34 = vpop.f32.mrf.mxu1 }
 0x361   : > { %1284 = vst.msk [vmem:[%s1953_s8 + $0xa0] sm:$0xff] %vm1263_vm2, %v1216_v34 }
 0x362   : > { %v1661_v35 = vpop.f32.mrf.mxu1 }
 0x363   : > { %1287 = vst.msk [vmem:[%s1953_s8 + $0xb8] sm:$0xff] %vm1263_vm2, %v1661_v35 }
 0x364   : > { %v1219_v36 = vpop.f32.mrf.mxu1 }
 0x365   : > { %1285 = vst.msk [vmem:[%s1953_s8 + $0xa8] sm:$0xff] %vm1263_vm2, %v1219_v36 }
 0x366   : > { %v1664_v37 = vpop.f32.mrf.mxu1 }
 0x367   : > { %1290 = vst.msk [vmem:[%s1953_s8 + $0xd0] sm:$0xff] %vm1263_vm2, %v1664_v37 }
 0x368   : > { %v1232_v38 = vpop.f32.mrf.mxu1 }
 0x369   : > { %1288 = vst.msk [vmem:[%s1953_s8 + $0xc0] sm:$0xff] %vm1263_vm2, %v1232_v38 }
 0x36a   : > { %v1665_v39 = vpop.f32.mrf.mxu1 }
 0x36b   : > { %1291 = vst.msk [vmem:[%s1953_s8 + $0xd8] sm:$0xff] %vm1263_vm2, %v1665_v39 }
 0x36c   : > { %v1235_v40 = vpop.f32.mrf.mxu1 }
 0x36d   : > { %1289 = vst.msk [vmem:[%s1953_s8 + $0xc8] sm:$0xff] %vm1263_vm2, %v1235_v40 }
 0x36e   : > { %v1668_v41 = vpop.f32.mrf.mxu1 }
 0x36f   : > { %1294 = vst.msk [vmem:[%s1953_s8 + $0xf0] sm:$0xff] %vm1263_vm2, %v1668_v41 }
 0x370   : > { %v1248_v42 = vpop.f32.mrf.mxu1 }
 0x371   : > { %1292 = vst.msk [vmem:[%s1953_s8 + $0xe0] sm:$0xff] %vm1263_vm2, %v1248_v42 }
 0x372   : > { %v1669_v43 = vpop.f32.mrf.mxu1 }
 0x373   : > { %1295 = vst.msk [vmem:[%s1953_s8 + $0xf8] sm:$0xff] %vm1263_vm2, %v1669_v43 }
 0x374   : > { %v1251_v44 = vpop.f32.mrf.mxu1 }
 0x375   : > { %1293 = vst.msk [vmem:[%s1953_s8 + $0xe8] sm:$0xff] %vm1263_vm2, %v1251_v44 }
 0x376 PF: > { %s15_s18 = sadd.s32 1, %s1726_s18  }
 0x377   : > { %p12_p4 = scmp.ge.s32.totalorder %s15_s18, 4  }
 0x379   :  { %14 = sbr.rel (!%p12_p4) target bundleno = 1 (0x1), region = 70 }

</bundles_post_ra>
